<compile_context>
chip_gen: v7x
topology: tpu7x:2x2x1
jax: 0.10.0
libtpu: 0.0.40
codegen_flags: <defaults>
</compile_context>

<pallas_src>
import math
import numpy as np
import jax
import jax.numpy as jnp
from jax.experimental import pallas as pl
from jax.experimental.pallas import tpu as pltpu


# ----------------------------------------------------------------------------
# Deterministic DCT filter construction (mirrors get_dct_filter in PyTorch).
# ----------------------------------------------------------------------------
def _build_filter(pos, freq, POS):
    result = math.cos(math.pi * freq * (pos + 0.5) / POS) / math.sqrt(POS)
    if freq == 0:
        return result
    return result * math.sqrt(2)


def get_dct_filter(tile_size_x, tile_size_y, mapper_x, mapper_y, channel):
    assert len(mapper_x) == len(mapper_y)
    assert channel % len(mapper_x) == 0
    dct_filter = np.zeros((channel, tile_size_x, tile_size_y), dtype=np.float32)
    c_part = channel // len(mapper_x)
    for i, (u_x, v_y) in enumerate(zip(mapper_x, mapper_y)):
        for t_x in range(tile_size_x):
            for t_y in range(tile_size_y):
                dct_filter[i * c_part:(i + 1) * c_part, t_x, t_y] = (
                    _build_filter(t_x, u_x, tile_size_x)
                    * _build_filter(t_y, v_y, tile_size_y)
                )
    return dct_filter


# ----------------------------------------------------------------------------
# Pallas kernel: per-tile multiply by the DCT filter + spatial reduction.
# ----------------------------------------------------------------------------
_LANE = 128
_RED_CHUNK = 512  # lanes per reduction chunk (multiple of 128)


def dct_pool_kernel(x_ref, w_ref, o_ref):
    # x_ref: (tn, tc, HW), w_ref: (tc, HW), o_ref: (tn, tc)
    tn, tc, hw = x_ref.shape

    # Tiny carried accumulator: (tn, tc) f32 — a handful of vregs, never spilled.
    acc = jnp.zeros((tn, tc), jnp.float32)

    n_full = hw // _RED_CHUNK
    for k in range(n_full):                      # static offsets, bounded chunk count
        lo = k * _RED_CHUNK
        xk = x_ref[:, :, lo:lo + _RED_CHUNK].astype(jnp.float32)
        wk = w_ref[:, lo:lo + _RED_CHUNK].astype(jnp.float32)
        acc = acc + jnp.sum(xk * wk[None, :, :], axis=-1)

    rem_lo = n_full * _RED_CHUNK
    if rem_lo < hw:                              # remainder (covers hw < _RED_CHUNK too)
        xr = x_ref[:, :, rem_lo:].astype(jnp.float32)
        wr = w_ref[:, rem_lo:].astype(jnp.float32)
        acc = acc + jnp.sum(xr * wr[None, :, :], axis=-1)

    o_ref[...] = acc.astype(o_ref.dtype)


# ----------------------------------------------------------------------------
# Generation-aware sizing helpers.
# ----------------------------------------------------------------------------
def _round_up(x, m):
    return ((x + m - 1) // m) * m


def _sublane_multiple(dtype):
    # f32 -> 8, bf16 -> 16, int8/fp8 -> 32 (sub-32-bit dtypes pack along sublanes).
    return max(8, 32 // jnp.dtype(dtype).itemsize)


def _vmem_capacity_bytes():
    try:
        return int(pltpu.get_tpu_info().vmem_capacity_bytes)
    except Exception:
        return 64 * 1024 * 1024  # conservative default (v7x per-core VMEM)


def _num_tensorcores():
    try:
        info = pltpu.get_tpu_info()
        for name in ("num_cores", "core_count", "num_tensorcores", "tensorcore_count"):
            v = getattr(info, name, None)
            if v:
                return int(v)
    except Exception:
        pass
    return 1


def _pick_channel_tile(c, cap=256):
    # Output block's last dim is tc: multiple of 128 (lane-dense store) or full C.
    legal = [t for t in range(_LANE, min(c, cap) + 1, _LANE) if c % t == 0]
    return max(legal) if legal else c


def _legal_batch_tiles(n, sub):
    # Output block's second-to-last dim is tn: multiple of the output-dtype
    # sublane packing (8 f32 / 16 bf16) or the full N.
    return sorted({t for t in range(1, n + 1) if n % t == 0 and (t % sub == 0 or t == n)})


def _pick_batch_tile(n, sub, max_rows):
    legal = _legal_batch_tiles(n, sub)
    fits = [t for t in legal if t <= max_rows]
    # Fallback (nothing fits the budget): take the smallest legal tile; the
    # caller re-derives vmem_limit_bytes from the tile actually chosen.
    return (max(fits) if fits else min(legal)), legal


# ----------------------------------------------------------------------------
# Wrapper: grid over (channel tiles, batch tiles), HW kept whole per tile.
# ----------------------------------------------------------------------------
def multi_spectral_dct_layer(x, weight):
    """x: (N, C, H, W), weight: (C, H, W) -> (N, C)."""
    N, C, H, W = x.shape
    assert weight.shape == (C, H, W)
    HW = H * W

    x_flat = x.reshape(N, C, HW)
    w_flat = weight.reshape(C, HW)
    out_dtype = jnp.result_type(x.dtype, weight.dtype)

    x_it = jnp.dtype(x.dtype).itemsize
    w_it = jnp.dtype(weight.dtype).itemsize
    o_it = jnp.dtype(out_dtype).itemsize

    HW_pad = _round_up(HW, _LANE)                 # lane padding of the spatial axis
    vmem_cap = _vmem_capacity_bytes()

    tc = _pick_channel_tile(C)
    sub_out = _sublane_multiple(out_dtype)

    # Raw x-tile cap: big enough to amortize the ~0.35us/step overhead, small
    # enough to keep in-kernel code size / intermediates sane; generation-aware.
    x_tile_budget = min(8 << 20, max(2 << 20, vmem_cap // 12))

    # Full VMEM accounting against ~55% of physical VMEM (padding + double
    # buffering of x/weight/out + f32 reduction intermediates).
    def _row_cost(tc_):
        tcx = _round_up(tc_, _sublane_multiple(x.dtype))
        return (2 * tcx * HW_pad * x_it                         # x, double-buffered
                + 2 * tcx * min(HW_pad, _RED_CHUNK) * 4         # f32 chunk intermediates
                + 2 * tc_ * o_it)                               # out, double-buffered

    tc_pad_w = _round_up(tc, _sublane_multiple(weight.dtype))
    fixed = 2 * tc_pad_w * HW_pad * w_it + (1 << 20)            # weight (2x) + slack
    total_budget = int(vmem_cap * 0.55)
    max_rows_budget = max(1, (total_budget - fixed) // _row_cost(tc))
    max_rows_tile = max(
        1, x_tile_budget // max(1, _round_up(tc, _sublane_multiple(x.dtype)) * HW_pad * x_it))
    max_rows = min(max_rows_budget, max_rows_tile)

    tn, legal_tn = _pick_batch_tile(N, sub_out, max_rows)

    # Megacore (v7x): make sure the grid has >= 2 blocks when 2 TensorCores
    # exist, while keeping block shapes legal. No-op on single-core chips.
    n_cores = _num_tensorcores()
    if n_cores >= 2 and (C // tc) * (N // tn) < 2:
        smaller_tn = [t for t in legal_tn if t < tn and (C // tc) * (N // t) >= 2]
        if smaller_tn:
            tn = max(smaller_tn)
        else:
            smaller_tc = [t for t in range(_LANE, tc, _LANE) if C % t == 0]
            if smaller_tc:
                tc = max(smaller_tc)
                tc_pad_w = _round_up(tc, _sublane_multiple(weight.dtype))

    # Derive vmem_limit_bytes from the tiles actually chosen (with headroom),
    # clamped to ~92% of the physical VMEM of this generation.
    tc_pad_x = _round_up(tc, _sublane_multiple(x.dtype))
    est = (2 * tn * tc_pad_x * HW_pad * x_it
           + 2 * tc_pad_w * HW_pad * w_it
           + 2 * _round_up(tn, sub_out) * _round_up(tc, _LANE) * o_it
           + 2 * tn * tc_pad_x * min(HW_pad, _RED_CHUNK) * 4
           + (1 << 20))
    vmem_limit = int(min(vmem_cap * 0.92, max(est * 1.25, 32 << 20)))

    grid = (C // tc, N // tn)   # batch innermost -> weight tile resident across it

    cost = pl.CostEstimate(
        flops=2 * N * C * HW,
        transcendentals=0,
        bytes_accessed=N * C * HW * x_it + C * HW * w_it + N * C * o_it,
    )

    return pl.pallas_call(
        dct_pool_kernel,
        out_shape=jax.ShapeDtypeStruct((N, C), out_dtype),
        grid=grid,
        in_specs=[
            pl.BlockSpec((tn, tc, HW), lambda c, n: (n, c, 0)),
            pl.BlockSpec((tc, HW), lambda c, n: (c, 0)),
        ],
        out_specs=pl.BlockSpec((tn, tc), lambda c, n: (n, c)),
        compiler_params=pltpu.CompilerParams(
            dimension_semantics=("parallel", "parallel"),
            vmem_limit_bytes=vmem_limit,
        ),
        cost_estimate=cost,
    )(x_flat, w_flat)


# ----------------------------------------------------------------------------
# Pure-JAX reference for sanity checking.
# ----------------------------------------------------------------------------
def reference(x, weight):
    return jnp.sum(
        x.astype(jnp.float32) * weight[None, :, :, :].astype(jnp.float32), axis=(2, 3)
    ).astype(jnp.result_type(x.dtype, weight.dtype))


if __name__ == "__main__":
    key = jax.random.PRNGKey(0)
    k1, k2, k3 = jax.random.split(key, 3)

    # --- Test 1: small shape consistent with the module (HW multiple of 128).
    batch, channel, height, width = 2, 4, 16, 16
    weight = jnp.asarray(get_dct_filter(height, width, [0, 1], [0, 1], channel))
    x = jax.random.normal(k1, (batch, channel, height, width), dtype=jnp.float32)
    out = jax.block_until_ready(multi_spectral_dct_layer(x, weight))
    np.testing.assert_allclose(
        np.asarray(out), np.asarray(reference(x, weight)), rtol=1e-5, atol=1e-4)

    # --- Test 2: 128-channel lane-dense path + HW<128 remainder path (7x7 stage).
    batch2, channel2, height2, width2 = 2, 128, 7, 7
    weight2 = jnp.asarray(
        get_dct_filter(height2, width2, [0, 1, 0, 1], [0, 0, 1, 1], channel2))
    x2 = jax.random.normal(k2, (batch2, channel2, height2, width2), dtype=jnp.float32)
    out2 = jax.block_until_ready(multi_spectral_dct_layer(x2, weight2))
    np.testing.assert_allclose(
        np.asarray(out2), np.asarray(reference(x2, weight2)), rtol=1e-5, atol=1e-4)

    # --- Test 3: large spatial stage (56x56) exercising the chunked reduction
    #     loop plus its non-128 remainder.
    batch3, channel3, height3, width3 = 2, 128, 56, 56
    weight3 = jnp.asarray(
        get_dct_filter(height3, width3, [0, 1, 2, 3], [0, 0, 1, 1], channel3))
    x3 = jax.random.normal(k3, (batch3, channel3, height3, width3), dtype=jnp.float32)
    out3 = jax.block_until_ready(multi_spectral_dct_layer(x3, weight3))
    np.testing.assert_allclose(
        np.asarray(out3), np.asarray(reference(x3, weight3)), rtol=1e-5, atol=1e-4)

    print("KERNEL_OK")
</pallas_src>

<mosaic_0001>
module attributes {stable_mosaic.version = 11 : i64} {
  func.func @dct_pool_kernel(%arg0: i32, %arg1: i32, %arg2: memref<2x4x256xf32, #tpu.memory_space<vmem>>, %arg3: memref<4x256xf32, #tpu.memory_space<vmem>>, %arg4: memref<2x4xf32, #tpu.memory_space<vmem>>) attributes {dimension_semantics = [#tpu.dimension_semantics<parallel>, #tpu.dimension_semantics<parallel>], iteration_bounds = array<i64: 1, 1>, scalar_prefetch = 0 : i64, scratch_operands = 0 : i64, tpu.core_type = #tpu.core_type<tc>, window_params = [{transform_indices = @transform_0, window_bounds = array<i64: 2, 4, 256>}, {transform_indices = @transform_1, window_bounds = array<i64: 4, 256>}, {transform_indices = @transform_2, window_bounds = array<i64: 2, 4>}]} {
    %cst = arith.constant 0.000000e+00 : f32
    %0 = vector.broadcast %cst : f32 to vector<2x4xf32>
    %c0 = arith.constant 0 : index
    %c0_0 = arith.constant 0 : index
    %c0_1 = arith.constant 0 : index
    %1 = vector.load %arg2[%c0, %c0_0, %c0_1] : memref<2x4x256xf32, #tpu.memory_space<vmem>>, vector<2x4x256xf32>
    %c0_2 = arith.constant 0 : index
    %c0_3 = arith.constant 0 : index
    %2 = vector.load %arg3[%c0_2, %c0_3] : memref<4x256xf32, #tpu.memory_space<vmem>>, vector<4x256xf32>
    %3 = vector.shape_cast %2 : vector<4x256xf32> to vector<1x4x256xf32>
    %4 = vector.broadcast %3 : vector<1x4x256xf32> to vector<2x4x256xf32>
    %5 = arith.mulf %1, %4 : vector<2x4x256xf32>
    %cst_4 = arith.constant dense<0.000000e+00> : vector<2x4xf32>
    %6 = vector.multi_reduction <add>, %5, %cst_4 [2] : vector<2x4x256xf32> to vector<2x4xf32>
    %7 = arith.addf %0, %6 : vector<2x4xf32>
    %c0_5 = arith.constant 0 : index
    %c0_6 = arith.constant 0 : index
    %8 = vector.load %arg4[%c0_5, %c0_6] : memref<2x4xf32, #tpu.memory_space<vmem>>, vector<2x4xf32>
    tpu.vector_store %arg4[%c0_5, %c0_6], %7 {strides = array<i32>} : memref<2x4xf32, #tpu.memory_space<vmem>>, vector<2x4xf32>,
    return
  }
  func.func @transform_0(%arg0: i32, %arg1: i32) -> (i32, i32, i32) {
    %c0_i32 = arith.constant 0 : i32
    %c0_i32_0 = arith.constant 0 : i32
    return %arg1, %arg0, %c0_i32 : i32, i32, i32
  }
  func.func @transform_1(%arg0: i32, %arg1: i32) -> (i32, i32) {
    %c0_i32 = arith.constant 0 : i32
    %c0_i32_0 = arith.constant 0 : i32
    return %arg0, %c0_i32 : i32, i32
  }
  func.func @transform_2(%arg0: i32, %arg1: i32) -> (i32, i32) {
    %c0_i32 = arith.constant 0 : i32
    return %arg1, %arg0 : i32, i32
  }
}

</mosaic_0001>

<bundles_post_ra>
// kernel: tpu_custom_call.1
= control target key start
LH: loop header
LB: loop body
LE: loop exit
PB: predicated region body
PF: predicated region fallthrough
CT: control target
= control target key end

     0   :  { %7 = vsyncpa [#allocation3], 0  ;;  %s228_s0 = inlined_call_operand.hbm [shape: f32[2,4,256], index: 0, kind: input, shape index: {}]   ;;  %s229_s1 = inlined_call_operand.hbm [shape: f32[4,256], index: 1, kind: input, shape index: {}]   ;;  %s230_s2 = inlined_call_operand.hbm [shape: f32[2,4], index: 2, kind: output, shape index: {}]  }
   0x1   :  { %8 = vsyncpa [#allocation6], 0 }
   0x2   :  { %9 = vsyncpa [#allocation4], 0  ;;  %s172_s9 = smov [#allocation2]   ;;  %s100_s13 = scalar_lea.hbm %s228_s0, 256 }
   0x3   :  { %s15_s10 = sshll.u32 %s172_s9, 4  ;;  %p101_p0 = scmp.ne.s32.totalorder %s228_s0, %s100_s13  ;;  %s16_s10 = int_to_ptr.vmem [resolvable:$true] %s15_s10 }
   0x4   :  { %p104_p1 = scmp.lt.u32.totalorder %s100_s13, %s228_s0 }
   0x6   :  { %p106_p2 = pnand %p104_p1, %p101_p0 }
   0x8   :  { %109 = shalt.err (!%p106_p2)
}
   0x9   :  { %s110_s18 = scalar_lea.vmem %s16_s10, 256  ;;  %p115_p4 = scmp.lt.s32.totalorder %s16_s10, %s16_s10 }
   0xa   :  { %p111_p3 = scmp.ne.s32.totalorder %s16_s10, %s110_s18  ;;  %p116_p5 = scmp.lt.s32.totalorder %s110_s18, %s110_s18 }
   0xc   :  { %p117_p6 = por %p116_p5, %p115_p4 }
   0xe   :  { %p118_p7 = pnand %p117_p6, %p111_p3 }
  0x10   :  { %121 = shalt.err (!%p118_p7)
}
  0x11   :  { %s173_s19 = smov 128   ;;  %s174_s20 = smov 8  }
  0x12   :  { %21 = dma.hbm_to_vmem [thread:$0]  %s228_s0, 256, %s16_s10, [#allocation3], %s173_s19, %s173_s19, %s174_s20  }
  0x13   :  { %s175_s23 = smov [#allocation5]   ;;  %s122_s27 = scalar_lea.hbm %s229_s1, 128 }
  0x14   :  { %s28_s24 = sshll.u32 %s175_s23, 4  ;;  %p123_p8 = scmp.ne.s32.totalorder %s229_s1, %s122_s27  ;;  %s29_s24 = int_to_ptr.vmem [resolvable:$true] %s28_s24 }
  0x15   :  { %p126_p9 = scmp.lt.u32.totalorder %s122_s27, %s229_s1 }
  0x17   :  { %p128_p10 = pnand %p126_p9, %p123_p8 }
  0x19   :  { %131 = shalt.err (!%p128_p10)
}
  0x1a   :  { %s132_s4 = scalar_lea.vmem %s29_s24, 128  ;;  %p137_p12 = scmp.lt.s32.totalorder %s29_s24, %s29_s24 }
  0x1b   :  { %p133_p11 = scmp.ne.s32.totalorder %s29_s24, %s132_s4  ;;  %p138_p13 = scmp.lt.s32.totalorder %s132_s4, %s132_s4 }
  0x1d   :  { %p139_p0 = por %p138_p13, %p137_p12 }
  0x1f   :  { %p140_p1 = pnand %p139_p0, %p133_p11 }
  0x21   :  { %143 = shalt.err (!%p140_p1)
}
  0x22   :  { %31 = dma.hbm_to_vmem [thread:$0]  %s229_s1, 128, %s29_s24, [#allocation6]  }
  0x23   :  { %166 = dma.done.wait [#allocation3], 256  }
  0x24   :  { %167 = vsyncadd [#allocation3], 4294967040 }
  0x25   :  { %168 = dma.done.wait [#allocation6], 128  }
  0x26   :  { %169 = vsyncadd [#allocation6], 4294967168  ;;  %v38_v0 = vld [vmem:[#allocation2] sm:$0xff]  ;;  %v40_v1 = vld [vmem:[#allocation5] sm:$0xff]  ;;  %vm49_vm0 = vcmask 1043456   ;;  %v64_v13 = vlaneseq  ;;  %s176_s1 = smov [#allocation7]  }
  0x27   :  { %v39_v2 = vld [vmem:[#allocation2 + $0x8] sm:$0xff]  ;;  %v41_v3 = vmul.f32 %v40_v1, %v38_v0  ;;  %s85_s6 = sshll.u32 %s176_s1, 4  ;;  %vm74_vm1 = vcmask 1041409   ;;  %vm77_vm2 = vcmask 25600   ;;  %s86_s6 = int_to_ptr.vmem [resolvable:$true] %s85_s6 }
  0x28   :  { %v42_v4 = vmul.f32 %v40_v1, %v39_v2  ;;  %v65_v14 = vand.u32 127, %v64_v13  ;;  %v67_v15 = vshrl.u32 %v64_v13, 7  ;;  %s144_s7 = scalar_lea.vmem %s86_s6, 32  ;;  %p149_p3 = scmp.lt.s32.totalorder %s86_s6, %s86_s6 }
  0x29   :  { %v45_v5 = vcombine.high %v41_v3, %v41_v3  ;;  %v50_v6 = vsel %vm49_vm0, %v41_v3, 0.0  ;;  %p145_p2 = scmp.ne.s32.totalorder %s86_s6, %s144_s7  ;;  %p150_p4 = scmp.lt.s32.totalorder %s144_s7, %s144_s7 }
  0x2a   :  { %v46_v7 = vcombine.high %v42_v4, %v42_v4  ;;  %v55_v9 = vsel %vm49_vm0, %v42_v4, 0.0  ;;  %v68_v17 = vsub.s32 %v65_v14, %v67_v15 }
  0x2b   :  { %v51_v8 = vsel %vm49_vm0, %v45_v5, 0.0  ;;  %p151_p5 = por %p150_p4, %p149_p3 }
  0x2c   :  { %v56_v10 = vsel %vm49_vm0, %v46_v7, 0.0  ;;  %v52_v11 = vadd.f32 %v51_v8, %v50_v6 }
  0x2d   :  { %v57_v12 = vadd.f32 %v56_v10, %v55_v9  ;;  %p152_p6 = pnand %p151_p5, %p145_p2 }
  0x2e   :  { %53 = vadd.xlane.f32.xlu0 %v52_v11 }
  0x32   :  { %58 = vadd.xlane.f32.xlu0 %v57_v12 }
  0xbb   :  { %v54_v16 = vpop.xlane.xlu0 %53 }
  0xbc   :  { %v69_v19 = vrot.slane %v54_v16, %v68_v17 }
  0xbf   :  { %v59_v18 = vpop.xlane.xlu0 %58 }
  0xc0   :  { %v73_v20 = vrot.slane %v59_v18, %v68_v17 }
  0xc2   :  { %v75_v21 = vsel %vm74_vm1, %v73_v20, %v69_v19 }
  0xc3   :  { %78 = vst.msk [vmem:[#allocation7] sm:$0x3] %vm77_vm2, %v75_v21 }
  0xc4   :  { %155 = shalt.err (!%p152_p6)
}
  0xc5   :  { %s156_s10 = scalar_lea.hbm %s230_s2, 32 }
  0xc6   :  { %p157_p7 = scmp.ne.s32.totalorder %s230_s2, %s156_s10  ;;  %p160_p8 = scmp.lt.u32.totalorder %s156_s10, %s230_s2 }
  0xc8   :  { %p162_p9 = pnand %p160_p8, %p157_p7 }
  0xca   :  { %165 = shalt.err (!%p162_p9)
}
  0xcb   :  { %88 = dma.vmem_to_hbm [thread:$0]  %s86_s6, 32, %s230_s2, [#allocation4]  }
  0xcc   :  { %170 = dma.done.wait [#allocation4], 32  }
  0xcd   :  { %171 = vsyncadd [#allocation4], 4294967264 }
  0xce   :  { %92 = vsyncpa [#allocation3], 1 }
  0xcf   :  { %93 = vsyncpa [#allocation6], 1 }
  0xd0   :  { %94 = vsyncpa [#allocation4], 1 }

</bundles_post_ra>
